<compile_context>
chip_gen: v6e
topology: v6e:2x2x1
jax: 0.10.0
libtpu: 0.0.40
codegen_flags: <defaults>
</compile_context>

<pallas_src>
import jax
import jax.numpy as jnp
from jax.experimental import pallas as pl
from jax.experimental.pallas import tpu as pltpu


def simplenet_kernel(params_ref, x_ref, o_ref):
    # params_ref: SMEM (4,) f32 -> [a1, a2, b1, b2]
    # x_ref:      VMEM (2, block_n)  -- lane-dense rows
    # o_ref:      VMEM (2, block_n)
    a1 = params_ref[0]
    a2 = params_ref[1]
    b1 = params_ref[2]
    b2 = params_ref[3]

    x = x_ref[...]                                   # (2, block_n)
    x1 = x[0:1, :]                                   # (1, block_n) full-lane rows
    x2 = x[1:2, :]

    h = a1 * x1 + a2 * x2
    rh = jnp.maximum(h, jnp.zeros_like(h))           # relu, computed once

    # Two full-lane-width (unmasked) row stores.
    o_ref[0:1, :] = rh * b1
    o_ref[1:2, :] = rh * b2


def _round_up(n, m):
    return ((n + m - 1) // m) * m


def simplenet_detail(x, params, *, tile_n=256 * 1024):
    """x: (N, 2) f32, params: (4,) f32 = [a1, a2, b1, b2]. Returns (N, 2)."""
    N, F = x.shape
    assert F == 2, "SimpleNet_detail expects 2 input features"
    dtype = x.dtype

    # Wrapper-side layout plumbing: rows onto the lane axis.
    xt = x.T                                          # (2, N)

    # Block size: multiple of 128 lanes, capped at tile_n (2 MiB f32 tiles),
    # so in+out double-buffered stays well under the scoped-VMEM limit on all
    # generations (v5e/v6e/v7x) while amortizing per-grid-step overhead.
    block_n = min(tile_n, _round_up(N, 128))
    n_pad = _round_up(N, block_n)
    if n_pad != N:
        xt = jnp.pad(xt, ((0, 0), (0, n_pad - N)))

    grid = (n_pad // block_n,)

    out_t = pl.pallas_call(
        simplenet_kernel,
        out_shape=jax.ShapeDtypeStruct((2, n_pad), dtype),
        grid=grid,
        in_specs=[
            pl.BlockSpec(memory_space=pltpu.MemorySpace.SMEM),   # params, untiled
            pl.BlockSpec((2, block_n), lambda i: (0, i)),        # lane-dense tiles
        ],
        out_specs=pl.BlockSpec((2, block_n), lambda i: (0, i)),
        compiler_params=pltpu.CompilerParams(
            dimension_semantics=("parallel",)),                  # megacore-shardable
    )(params, xt)

    return out_t[:, :N].T                              # back to (N, 2)


if __name__ == "__main__":
    key = jax.random.PRNGKey(0)
    # Small shape consistent with the module: x is (N, 2).  N is deliberately
    # not a multiple of 128 to exercise the pad/slice path.
    N = 200
    x = jax.random.normal(key, (N, 2), dtype=jnp.float32)

    # Deterministic parameter init matching nn.Parameter(torch.tensor(1.0)) x4.
    params = jnp.array([1.0, 1.0, 1.0, 1.0], dtype=jnp.float32)  # a1, a2, b1, b2

    out = jax.block_until_ready(simplenet_detail(x, params))

    # Reference (plain JAX) check of forward semantics.
    a1, a2, b1, b2 = params
    h1 = a1 * x[:, 0:1] + a2 * x[:, 1:2]
    rh1 = jnp.maximum(h1, 0.0)
    ref = jnp.concatenate([rh1 * b1, rh1 * b2], axis=1)

    assert out.shape == (N, 2)
    assert jnp.allclose(out, ref, atol=1e-6), "mismatch vs reference"
    print("KERNEL_OK")
</pallas_src>

<mosaic_0001>
module attributes {stable_mosaic.version = 11 : i64} {
  func.func @simplenet_kernel(%arg0: i32, %arg1: memref<4xf32, #tpu.memory_space<smem>>, %arg2: memref<2x256xf32, #tpu.memory_space<vmem>>, %arg3: memref<2x256xf32, #tpu.memory_space<vmem>>) attributes {dimension_semantics = [#tpu.dimension_semantics<parallel>], iteration_bounds = array<i64: 1>, scalar_prefetch = 0 : i64, scratch_operands = 0 : i64, tpu.core_type = #tpu.core_type<tc>, window_params = [{transform_indices = @transform_0, window_bounds = array<i64: 4>}, {transform_indices = @transform_1, window_bounds = array<i64: 2, 256>}, {transform_indices = @transform_2, window_bounds = array<i64: 2, 256>}]} {
    %c0 = arith.constant 0 : index
    %0 = memref.load %arg1[%c0] : memref<4xf32, #tpu.memory_space<smem>>
    %c1 = arith.constant 1 : index
    %1 = memref.load %arg1[%c1] : memref<4xf32, #tpu.memory_space<smem>>
    %c2 = arith.constant 2 : index
    %2 = memref.load %arg1[%c2] : memref<4xf32, #tpu.memory_space<smem>>
    %c3 = arith.constant 3 : index
    %3 = memref.load %arg1[%c3] : memref<4xf32, #tpu.memory_space<smem>>
    %c0_0 = arith.constant 0 : index
    %c0_1 = arith.constant 0 : index
    %4 = vector.load %arg2[%c0_0, %c0_1] : memref<2x256xf32, #tpu.memory_space<vmem>>, vector<2x256xf32>
    %5 = vector.extract_strided_slice %4 {offsets = [0, 0], sizes = [1, 256], strides = [1, 1]} : vector<2x256xf32> to vector<1x256xf32>
    %6 = vector.extract_strided_slice %4 {offsets = [1, 0], sizes = [1, 256], strides = [1, 1]} : vector<2x256xf32> to vector<1x256xf32>
    %7 = vector.broadcast %0 : f32 to vector<1x256xf32>
    %8 = arith.mulf %7, %5 : vector<1x256xf32>
    %9 = vector.broadcast %1 : f32 to vector<1x256xf32>
    %10 = arith.mulf %9, %6 : vector<1x256xf32>
    %11 = arith.addf %8, %10 : vector<1x256xf32>
    %cst = arith.constant 0.000000e+00 : f32
    %12 = vector.broadcast %cst : f32 to vector<1x256xf32>
    %13 = arith.maximumf %11, %12 : vector<1x256xf32>
    %14 = vector.broadcast %2 : f32 to vector<1x256xf32>
    %15 = arith.mulf %13, %14 : vector<1x256xf32>
    %c0_2 = arith.constant 0 : index
    %c0_3 = arith.constant 0 : index
    %16 = vector.load %arg3[%c0_2, %c0_3] : memref<2x256xf32, #tpu.memory_space<vmem>>, vector<1x256xf32>
    tpu.vector_store %arg3[%c0_2, %c0_3], %15 {strides = array<i32>} : memref<2x256xf32, #tpu.memory_space<vmem>>, vector<1x256xf32>,
    %17 = vector.broadcast %3 : f32 to vector<1x256xf32>
    %18 = arith.mulf %13, %17 : vector<1x256xf32>
    %c1_4 = arith.constant 1 : index
    %c0_5 = arith.constant 0 : index
    %19 = vector.load %arg3[%c1_4, %c0_5] : memref<2x256xf32, #tpu.memory_space<vmem>>, vector<1x256xf32>
    tpu.vector_store %arg3[%c1_4, %c0_5], %18 {strides = array<i32>} : memref<2x256xf32, #tpu.memory_space<vmem>>, vector<1x256xf32>,
    return
  }
  func.func @transform_0(%arg0: i32) -> i32 {
    %c0_i32 = arith.constant 0 : i32
    %c0_i32_0 = arith.constant 0 : i32
    return %c0_i32 : i32
  }
  func.func @transform_1(%arg0: i32) -> (i32, i32) {
    %c0_i32 = arith.constant 0 : i32
    %c0_i32_0 = arith.constant 0 : i32
    return %c0_i32, %arg0 : i32, i32
  }
  func.func @transform_2(%arg0: i32) -> (i32, i32) {
    %c0_i32 = arith.constant 0 : i32
    %c0_i32_0 = arith.constant 0 : i32
    return %c0_i32, %arg0 : i32, i32
  }
}

</mosaic_0001>

<bundles_post_ra>
// kernel: tpu_custom_call.1
= control target key start
LH: loop header
LB: loop body
LE: loop exit
PB: predicated region body
PF: predicated region fallthrough
CT: control target
= control target key end

     0   :  { %7 = vsyncpa [#allocation5], 0  ;;  %s185_s0 = inlined_call_operand.hbm [shape: f32[4], index: 0, kind: input, shape index: {}]   ;;  %s186_s1 = inlined_call_operand.hbm [shape: f32[2,256], index: 1, kind: input, shape index: {}]   ;;  %s187_s2 = inlined_call_operand.hbm [shape: f32[2,256], index: 2, kind: output, shape index: {}]  }
   0x1   :  { %8 = vsyncpa [#allocation3], 0 }
   0x2   :  { %9 = vsyncpa [#allocation4], 0  ;;  %s157_s9 = smov [#allocation2]   ;;  %s158_s12 = smov [#allocation6]  }
   0x3   :  { %17 = dma.hbm_to_smem %s185_s0, 16, %s157_s9, [#allocation5]  }
   0x4   :  { %s24_s13 = sshll.u32 %s158_s12, 4  ;;  %s25_s13 = int_to_ptr.vmem [resolvable:$true] %s24_s13 }
   0x5   :  { %s119_s14 = scalar_lea.vmem %s25_s13, 64  ;;  %p124_p1 = scmp.lt.s32.totalorder %s25_s13, %s25_s13 }
   0x6   :  { %p120_p0 = scmp.ne.s32.totalorder %s25_s13, %s119_s14  ;;  %p125_p2 = scmp.lt.s32.totalorder %s119_s14, %s119_s14 }
   0x8   :  { %p126_p3 = por %p125_p2, %p124_p1 }
   0xa   :  { %p127_p4 = pnand %p126_p3, %p120_p0 }
   0xc   :  { %130 = shalt.err (!%p127_p4)
}
   0xd   :  { %27 = dma.hbm_to_vmem [thread:$0]  %s186_s1, 64, %s25_s13, [#allocation3]  }
   0xe   :  { %151 = dma.done.wait [#allocation5], 16  }
   0xf   :  { %152 = vsyncadd [#allocation5], 4294967280 }
  0x10   :  { %153 = dma.done.wait [#allocation3], 64  }
  0x11   :  { %154 = vsyncadd [#allocation3], 4294967232 }
  0x12   :  { %34 = sfence }
  0x13   :  { %s35_s0 = sld [smem:[#allocation2]]  ;;  %v39_v0 = vld [vmem:[#allocation6] sm:$0xf]  ;;  %v159_v2 = vmov 1966171168   ;;  %v56_v4 = vlaneseq  ;;  %s160_s1 = smov [#allocation7]  }
  0x14   :  { %s95_s17 = sld [smem:[#allocation2 + $0x1]]  ;;  %v54_v3 = vunpack.c.l.s4 %v159_v2  ;;  %s85_s20 = sshll.u32 %s160_s1, 4  ;;  %s86_s20 = int_to_ptr.vmem [resolvable:$true] %s85_s20 }
  0x15   :  { %s96_s18 = sld [smem:[#allocation2 + $0x2]]  ;;  %v57_v10 = vshrl.u32 %v56_v4, 7  ;;  %vm63_vm0 = vcmp.lt.s32.totalorder %v56_v4, 256  ;;  %s131_s21 = scalar_lea.vmem %s86_s20, 64 }
  0x16   :  { %s97_s19 = sld [smem:[#allocation2 + $0x3]]  ;;  %v55_v9 = vunpack.c.0.s8 %v54_v3  ;;  %p132_p5 = scmp.ne.s32.totalorder %s86_s20, %s131_s21 }
  0x17   :  { %p136_p6 = scmp.lt.s32.totalorder %s86_s20, %s86_s20  ;;  %p137_p7 = scmp.lt.s32.totalorder %s131_s21, %s131_s21 }
  0x18   :  { %v58_v15 = vsub.s32 %v55_v9, %v57_v10 }
  0x19   :  { %v40_v1 = vstv %s35_s0  ;;  %p138_p8 = por %p137_p7, %p136_p6 }
  0x1a   :  { %v42_v5 = vstv %s95_s17  ;;  %v41_v6 = vmul.f32 %v40_v1, %v39_v0 }
  0x1b   :  { %v43_v7 = vmul.f32 %v42_v5, %v39_v0  ;;  %v50_v12 = vstv %s96_s18  ;;  %p139_p9 = pnand %p138_p8, %p132_p5 }
  0x1c   :  { %v66_v13 = vstv %s97_s19 }
  0x1d   :  { %v98_v8 = vrot.slane %v43_v7, 9 }
  0x1f   :  { %v48_v11 = vadd.f32 %v98_v8, %v41_v6 }
  0x21   :  { %v49_v14 = vmax.f32 %v48_v11, 0.0 }
  0x23   :  { %v51_v16 = vmul.f32 %v50_v12, %v49_v14  ;;  %v67_v17 = vmul.f32 %v66_v13, %v49_v14 }
  0x25   :  { %v59_v18 = vrot.slane %v51_v16, %v58_v15  ;;  %v75_v19 = vrot.slane %v67_v17, %v58_v15 }
  0x27   :  { %65 = vst.msk [vmem:[#allocation7] ss:$2 sm:$0x3] %vm63_vm0, %v59_v18  ;;  %78 = vst.msk [vmem:[#allocation7 + $0x1] ss:$2 sm:$0x3] %vm63_vm0, %v75_v19 }
  0x28   :  { %142 = shalt.err (!%p139_p9)
}
  0x29   :  { %88 = dma.vmem_to_hbm [thread:$0]  %s86_s20, 64, %s187_s2, [#allocation4]  }
  0x2a   :  { %155 = dma.done.wait [#allocation4], 64  }
  0x2b   :  { %156 = vsyncadd [#allocation4], 4294967232 }
  0x2c   :  { %92 = vsyncpa [#allocation3], 1 }
  0x2d   :  { %93 = vsyncpa [#allocation4], 1 }
  0x2e   :  { %94 = vsyncpa [#allocation5], 1 }

</bundles_post_ra>
